<compile_context>
chip_gen: v6e
topology: v6e:2x2x1
jax: 0.10.0
libtpu: 0.0.40
codegen_flags: <defaults>
</compile_context>

<pallas_src>
import jax
import jax.numpy as jnp
from jax.experimental import pallas as pl
from jax.experimental.pallas import tpu as pltpu


_LANE = 128
_ROW = 16                           # row granule (bf16-friendly sublane packing)
_MAX_TB = 512                       # 512-row tiles ~85% of HBM roofline (v5e/v6e)
_VMEM_BUDGET = 32 * 1024 * 1024     # conservative tile budget across v5e/v6e/v7x
_VMEM_HEADROOM = 8 * 1024 * 1024
_VMEM_CAP = 48 * 1024 * 1024        # never request more than this


def _round_up(x, m):
    return ((x + m - 1) // m) * m


def _cdiv(a, b):
    return (a + b - 1) // b


# ---------------------------------------------------------------------------
# Kernels
# ---------------------------------------------------------------------------

def _fused_bottleneck_kernel(x_ref, w1_ref, b1_ref, w2_ref, b2_ref, o_ref, h_ref):
    # h = x @ w1 + b1 : computed once per batch tile, cached in VMEM scratch.
    @pl.when(pl.program_id(1) == 0)
    def _():
        h_ref[...] = (
            jnp.dot(x_ref[...], w1_ref[...], preferred_element_type=jnp.float32)
            + b1_ref[...])

    # o[:, j-tile] = h @ w2[:, j-tile] + b2[j-tile]
    o = (jnp.dot(h_ref[...].astype(w2_ref.dtype), w2_ref[...],
                 preferred_element_type=jnp.float32) + b2_ref[...])
    o_ref[...] = o.astype(o_ref.dtype)


def _linear_kernel(x_ref, w_ref, b_ref, o_ref):
    acc = jnp.dot(x_ref[...], w_ref[...], preferred_element_type=jnp.float32)
    o_ref[...] = (acc + b_ref[...]).astype(o_ref.dtype)


# ---------------------------------------------------------------------------
# Tiling helpers
# ---------------------------------------------------------------------------

def _pick_out_tile(out_p):
    # Largest multiple-of-128 divisor of out_p that is <= 512.
    m = out_p // _LANE
    for d in (4, 3, 2, 1):
        if m % d == 0:
            return _LANE * d
    return _LANE


def _pick_batch_tile(batch, per_row_bytes, fixed_bytes):
    avail = max(_VMEM_BUDGET - fixed_bytes, per_row_bytes * _ROW)
    cap = max(_ROW, min(_MAX_TB, (avail // per_row_bytes) // _ROW * _ROW))
    # Balanced tiling: last tile is nearly full (no padding to a fixed cap).
    num_tiles = _cdiv(batch, cap)
    tb = _round_up(_cdiv(batch, num_tiles), _ROW)
    return tb, tb * num_tiles


def _pad_cast_x(x, b_pad, in_p):
    b, in_f = x.shape
    x = x.astype(jnp.bfloat16)
    if b_pad == b and in_p == in_f:
        return x
    return jnp.pad(x, ((0, b_pad - b), (0, in_p - in_f)))


# ---------------------------------------------------------------------------
# Wrappers
# ---------------------------------------------------------------------------

def bottleneck_fused(x, w1_t, b1, w2_t, b2, out_dtype=None):
    """Padded slab (b_pad, out_p) of (x @ w1_t + b1) @ w2_t + b2 (one pallas_call)."""
    batch = x.shape[0]
    in_p, lat_p = w1_t.shape
    out_p = w2_t.shape[1]
    out_dtype = out_dtype or x.dtype
    out_bytes = jnp.dtype(out_dtype).itemsize
    tn = _pick_out_tile(out_p)

    # VMEM plan: w1/b1 single-buffered resident; w2/b2 stream in (lat_p, tn)
    # column tiles (double-buffered); x tile double-buffered bf16; h scratch f32.
    fixed = (in_p * lat_p * 2 + lat_p * 4            # w1 (bf16) + b1 (f32)
             + 2 * (lat_p * tn * 2 + tn * 4))        # w2/b2 streaming buffers
    per_row = 2 * in_p * 2 + 2 * tn * out_bytes + lat_p * 4
    tb, b_pad = _pick_batch_tile(batch, per_row, fixed)
    vmem_limit = int(min(fixed + tb * per_row + _VMEM_HEADROOM, _VMEM_CAP))

    x_p = _pad_cast_x(x, b_pad, in_p)
    grid = (b_pad // tb, out_p // tn)

    flops = 2 * b_pad * (in_p * lat_p + lat_p * out_p)
    bytes_accessed = (2 * (b_pad * in_p + in_p * lat_p + lat_p * out_p)
                      + 4 * (lat_p + out_p) + out_bytes * b_pad * out_p)

    return pl.pallas_call(
        _fused_bottleneck_kernel,
        out_shape=jax.ShapeDtypeStruct((b_pad, out_p), out_dtype),
        grid_spec=pltpu.PrefetchScalarGridSpec(
            num_scalar_prefetch=0,
            grid=grid,
            in_specs=[
                pl.BlockSpec((tb, in_p), lambda i, j: (i, 0)),      # x (pipelined over i)
                pl.BlockSpec((in_p, lat_p), lambda i, j: (0, 0),    # w1 resident, 1 buffer
                             pipeline_mode=pl.Buffered(1)),
                pl.BlockSpec((1, lat_p), lambda i, j: (0, 0),       # b1 resident, 1 buffer
                             pipeline_mode=pl.Buffered(1)),
                pl.BlockSpec((lat_p, tn), lambda i, j: (0, j)),     # w2 streams over j
                pl.BlockSpec((1, tn), lambda i, j: (0, j)),         # b2 streams over j
            ],
            out_specs=pl.BlockSpec((tb, tn), lambda i, j: (i, j)),
            scratch_shapes=[pltpu.VMEM((tb, lat_p), jnp.float32)],  # cached h
        ),
        compiler_params=pltpu.CompilerParams(
            dimension_semantics=("parallel", "arbitrary"),
            vmem_limit_bytes=vmem_limit),
        cost_estimate=pl.CostEstimate(
            flops=flops, transcendentals=0, bytes_accessed=bytes_accessed),
    )(x_p, w1_t, b1, w2_t, b2)


def bottleneck_features(x, w1_t, b1, out_dtype=None):
    """Padded slab (b_pad, lat_p) of x @ w1_t + b1 (linear1 only)."""
    batch = x.shape[0]
    in_p, lat_p = w1_t.shape
    out_dtype = out_dtype or x.dtype
    out_bytes = jnp.dtype(out_dtype).itemsize

    fixed = in_p * lat_p * 2 + lat_p * 4
    per_row = 2 * in_p * 2 + 2 * lat_p * out_bytes
    tb, b_pad = _pick_batch_tile(batch, per_row, fixed)
    vmem_limit = int(min(fixed + tb * per_row + _VMEM_HEADROOM, _VMEM_CAP))

    x_p = _pad_cast_x(x, b_pad, in_p)
    grid = (b_pad // tb,)

    flops = 2 * b_pad * in_p * lat_p
    bytes_accessed = (2 * (b_pad * in_p + in_p * lat_p) + 4 * lat_p
                      + out_bytes * b_pad * lat_p)

    return pl.pallas_call(
        _linear_kernel,
        out_shape=jax.ShapeDtypeStruct((b_pad, lat_p), out_dtype),
        grid_spec=pltpu.PrefetchScalarGridSpec(
            num_scalar_prefetch=0,
            grid=grid,
            in_specs=[
                pl.BlockSpec((tb, in_p), lambda i: (i, 0)),
                pl.BlockSpec((in_p, lat_p), lambda i: (0, 0),
                             pipeline_mode=pl.Buffered(1)),
                pl.BlockSpec((1, lat_p), lambda i: (0, 0),
                             pipeline_mode=pl.Buffered(1)),
            ],
            out_specs=pl.BlockSpec((tb, lat_p), lambda i: (i, 0)),
        ),
        compiler_params=pltpu.CompilerParams(
            dimension_semantics=("parallel",),
            vmem_limit_bytes=vmem_limit),
        cost_estimate=pl.CostEstimate(
            flops=flops, transcendentals=0, bytes_accessed=bytes_accessed),
    )(x_p, w1_t, b1)


# ---------------------------------------------------------------------------
# Module
# ---------------------------------------------------------------------------

class BottleneckPallas:
    """JAX/Pallas port of the PyTorch Bottleneck module."""

    def __init__(self, conv_out_size, latent_size, key):
        self.conv_out_size = conv_out_size
        self.latent_size = latent_size
        self.in_p = _round_up(conv_out_size, _LANE)
        self.lat_p = _round_up(latent_size, _LANE)
        self.out_p = _round_up(conv_out_size, _LANE)

        k1, k2, k3, k4 = jax.random.split(key, 4)
        # Init mimicking nn.Linear's uniform(-1/sqrt(fan_in), 1/sqrt(fan_in)).
        bound1 = 1.0 / jnp.sqrt(conv_out_size)
        bound2 = 1.0 / jnp.sqrt(latent_size)
        self.w1 = jax.random.uniform(k1, (latent_size, conv_out_size),
                                     jnp.float32, -bound1, bound1)
        self.b1 = jax.random.uniform(k2, (latent_size,),
                                     jnp.float32, -bound1, bound1)
        self.w2 = jax.random.uniform(k3, (conv_out_size, latent_size),
                                     jnp.float32, -bound2, bound2)
        self.b2 = jax.random.uniform(k4, (conv_out_size,),
                                     jnp.float32, -bound2, bound2)

        # Kernel layout: pre-transposed to (in, out), zero-padded to lane-dense
        # (multiple-of-128) dims, weights cast to bf16 ONCE at init. Biases stay
        # f32 (added to the f32 MXU accumulator; negligible bytes).
        self.w1_t = jnp.pad(
            self.w1.T.astype(jnp.bfloat16),
            ((0, self.in_p - conv_out_size), (0, self.lat_p - latent_size)))
        self.b1_p = jnp.pad(self.b1, (0, self.lat_p - latent_size)).reshape(1, self.lat_p)
        self.w2_t = jnp.pad(
            self.w2.T.astype(jnp.bfloat16),
            ((0, self.lat_p - latent_size), (0, self.out_p - conv_out_size)))
        self.b2_p = jnp.pad(self.b2, (0, self.out_p - conv_out_size)).reshape(1, self.out_p)

    def __call__(self, x, return_features=False):
        batch = x.shape[0]
        if return_features:
            y = bottleneck_features(x, self.w1_t, self.b1_p, out_dtype=x.dtype)
            if y.shape == (batch, self.latent_size):
                return y
            return y[:batch, :self.latent_size]        # single slice
        y = bottleneck_fused(x, self.w1_t, self.b1_p, self.w2_t, self.b2_p,
                             out_dtype=x.dtype)
        if y.shape == (batch, self.conv_out_size):
            return y
        return y[:batch, :self.conv_out_size]           # single slice


if __name__ == "__main__":
    key = jax.random.PRNGKey(0)
    k_param, k_x = jax.random.split(key)

    batch = 2
    conv_out_size = 32
    latent_size = 8

    model = BottleneckPallas(conv_out_size, latent_size, k_param)
    x = jax.random.normal(k_x, (batch, conv_out_size), jnp.float32)

    # Full forward (linear1 -> linear2), fused in a single pallas_call.
    y = model(x, return_features=False)
    jax.block_until_ready(y)

    # Feature path (linear1 only).
    feats = model(x, return_features=True)
    jax.block_until_ready(feats)

    # Reference check in plain JAX (f32); kernel computes in bf16 on the MXU,
    # so use bf16-level tolerances.
    ref_feats = x @ model.w1.T + model.b1
    ref_y = ref_feats @ model.w2.T + model.b2
    assert y.shape == (batch, conv_out_size)
    assert feats.shape == (batch, latent_size)
    assert jnp.allclose(y, ref_y, atol=2e-2, rtol=2e-2)
    assert jnp.allclose(feats, ref_feats, atol=2e-2, rtol=2e-2)

    print("KERNEL_OK")
</pallas_src>

<mosaic_0001>
module attributes {stable_mosaic.version = 11 : i64} {
  func.func @_fused_bottleneck_kernel(%arg0: i32, %arg1: i32, %arg2: memref<16x128xbf16, #tpu.memory_space<vmem>>, %arg3: memref<128x128xbf16, #tpu.memory_space<vmem>>, %arg4: memref<1x128xf32, #tpu.memory_space<vmem>>, %arg5: memref<128x128xbf16, #tpu.memory_space<vmem>>, %arg6: memref<1x128xf32, #tpu.memory_space<vmem>>, %arg7: memref<16x128xf32, #tpu.memory_space<vmem>>, %arg8: memref<16x128xf32, #tpu.memory_space<vmem>>) attributes {dimension_semantics = [#tpu.dimension_semantics<parallel>, #tpu.dimension_semantics<arbitrary>], iteration_bounds = array<i64: 1, 1>, scalar_prefetch = 0 : i64, scratch_operands = 1 : i64, tpu.core_type = #tpu.core_type<tc>, window_params = [{transform_indices = @transform_0, window_bounds = array<i64: 16, 128>}, {pipeline_mode = #tpu.pipeline_mode<synchronous>, transform_indices = @transform_1, window_bounds = array<i64: 128, 128>}, {pipeline_mode = #tpu.pipeline_mode<synchronous>, transform_indices = @transform_2, window_bounds = array<i64: 1, 128>}, {transform_indices = @transform_3, window_bounds = array<i64: 128, 128>}, {transform_indices = @transform_4, window_bounds = array<i64: 1, 128>}, {transform_indices = @transform_5, window_bounds = array<i64: 16, 128>}]} {
    %c0_i32 = arith.constant 0 : i32
    %0 = arith.cmpi eq, %arg1, %c0_i32 : i32
    %1 = arith.extui %0 : i1 to i32
    %c0_i32_0 = arith.constant 0 : i32
    %2 = arith.cmpi ne, %1, %c0_i32_0 : i32
    scf.if %2 {
      %c0_8 = arith.constant 0 : index
      %c0_9 = arith.constant 0 : index
      %11 = vector.load %arg2[%c0_8, %c0_9] : memref<16x128xbf16, #tpu.memory_space<vmem>>, vector<16x128xbf16>
      %c0_10 = arith.constant 0 : index
      %c0_11 = arith.constant 0 : index
      %12 = vector.load %arg3[%c0_10, %c0_11] : memref<128x128xbf16, #tpu.memory_space<vmem>>, vector<128x128xbf16>
      %cst_12 = arith.constant dense<0.000000e+00> : vector<16x128xf32>
      %13 = tpu.matmul %11, %12, %cst_12 {dimension_numbers = #tpu.dot_dimension_numbers<[1], [0], [0], [1], [0, 0, 1, 1], [], []>} : vector<16x128xbf16>, vector<128x128xbf16>, vector<16x128xf32> -> vector<16x128xf32>
      %c0_13 = arith.constant 0 : index
      %c0_14 = arith.constant 0 : index
      %14 = vector.load %arg4[%c0_13, %c0_14] : memref<1x128xf32, #tpu.memory_space<vmem>>, vector<1x128xf32>
      %15 = vector.broadcast %14 : vector<1x128xf32> to vector<16x128xf32>
      %16 = arith.addf %13, %15 : vector<16x128xf32>
      %c0_15 = arith.constant 0 : index
      %c0_16 = arith.constant 0 : index
      %17 = vector.load %arg8[%c0_15, %c0_16] : memref<16x128xf32, #tpu.memory_space<vmem>>, vector<16x128xf32>
      tpu.vector_store %arg8[%c0_15, %c0_16], %16 {strides = array<i32>} : memref<16x128xf32, #tpu.memory_space<vmem>>, vector<16x128xf32>,
    } else {
    }
    %c0 = arith.constant 0 : index
    %c0_1 = arith.constant 0 : index
    %3 = vector.load %arg8[%c0, %c0_1] : memref<16x128xf32, #tpu.memory_space<vmem>>, vector<16x128xf32>
    %4 = arith.truncf %3 : vector<16x128xf32> to vector<16x128xbf16>
    %c0_2 = arith.constant 0 : index
    %c0_3 = arith.constant 0 : index
    %5 = vector.load %arg5[%c0_2, %c0_3] : memref<128x128xbf16, #tpu.memory_space<vmem>>, vector<128x128xbf16>
    %cst = arith.constant dense<0.000000e+00> : vector<16x128xf32>
    %6 = tpu.matmul %4, %5, %cst {dimension_numbers = #tpu.dot_dimension_numbers<[1], [0], [0], [1], [0, 0, 1, 1], [], []>} : vector<16x128xbf16>, vector<128x128xbf16>, vector<16x128xf32> -> vector<16x128xf32>
    %c0_4 = arith.constant 0 : index
    %c0_5 = arith.constant 0 : index
    %7 = vector.load %arg6[%c0_4, %c0_5] : memref<1x128xf32, #tpu.memory_space<vmem>>, vector<1x128xf32>
    %8 = vector.broadcast %7 : vector<1x128xf32> to vector<16x128xf32>
    %9 = arith.addf %6, %8 : vector<16x128xf32>
    %c0_6 = arith.constant 0 : index
    %c0_7 = arith.constant 0 : index
    %10 = vector.load %arg7[%c0_6, %c0_7] : memref<16x128xf32, #tpu.memory_space<vmem>>, vector<16x128xf32>
    tpu.vector_store %arg7[%c0_6, %c0_7], %9 {strides = array<i32>} : memref<16x128xf32, #tpu.memory_space<vmem>>, vector<16x128xf32>,
    return
  }
  func.func @transform_0(%arg0: i32, %arg1: i32) -> (i32, i32) {
    %c0_i32 = arith.constant 0 : i32
    %c0_i32_0 = arith.constant 0 : i32
    return %arg0, %c0_i32 : i32, i32
  }
  func.func @transform_1(%arg0: i32, %arg1: i32) -> (i32, i32) {
    %c0_i32 = arith.constant 0 : i32
    %c0_i32_0 = arith.constant 0 : i32
    %c0_i32_1 = arith.constant 0 : i32
    return %c0_i32, %c0_i32_0 : i32, i32
  }
  func.func @transform_2(%arg0: i32, %arg1: i32) -> (i32, i32) {
    %c0_i32 = arith.constant 0 : i32
    %c0_i32_0 = arith.constant 0 : i32
    %c0_i32_1 = arith.constant 0 : i32
    return %c0_i32, %c0_i32_0 : i32, i32
  }
  func.func @transform_3(%arg0: i32, %arg1: i32) -> (i32, i32) {
    %c0_i32 = arith.constant 0 : i32
    %c0_i32_0 = arith.constant 0 : i32
    return %c0_i32, %arg1 : i32, i32
  }
  func.func @transform_4(%arg0: i32, %arg1: i32) -> (i32, i32) {
    %c0_i32 = arith.constant 0 : i32
    %c0_i32_0 = arith.constant 0 : i32
    return %c0_i32, %arg1 : i32, i32
  }
  func.func @transform_5(%arg0: i32, %arg1: i32) -> (i32, i32) {
    %c0_i32 = arith.constant 0 : i32
    return %arg0, %arg1 : i32, i32
  }
}

</mosaic_0001>

<bundles_post_ra>
// kernel: tpu_custom_call.1
= control target key start
LH: loop header
LB: loop body
LE: loop exit
PB: predicated region body
PF: predicated region fallthrough
CT: control target
= control target key end

     0   :  { %10 = vsyncpa [#allocation4], 0  ;;  %s572_s0 = inlined_call_operand.hbm [shape: bf16[16,128], index: 0, kind: input, shape index: {}]   ;;  %s573_s1 = inlined_call_operand.hbm [shape: bf16[128,128], index: 1, kind: input, shape index: {}]   ;;  %s574_s2 = inlined_call_operand.vmem [shape: f32[1,128], index: 2, kind: input, shape index: {}]   ;;  %s575_s3 = inlined_call_operand.hbm [shape: bf16[128,128], index: 3, kind: input, shape index: {}]   ;;  %s576_s4 = inlined_call_operand.vmem [shape: f32[1,128], index: 4, kind: input, shape index: {}]   ;;  %s577_s5 = inlined_call_operand.hbm [shape: f32[16,128], index: 5, kind: output, shape index: {}]  }
   0x1   :  { %11 = vsyncpa [#allocation7], 0 }
   0x2   :  { %12 = vsyncpa [#allocation5], 0  ;;  %s514_s18 = smov [#allocation6]   ;;  %s515_s20 = smov [#allocation3]  }
   0x3   :  { %s30_s19 = sshll.u32 %s514_s18, 4  ;;  %s18_s21 = sshll.u32 %s515_s20, 4  ;;  %s31_s19 = int_to_ptr.vmem [resolvable:$true] %s30_s19  ;;  %s19_s21 = int_to_ptr.vmem [resolvable:$true] %s18_s21 }
   0x4   :  { %s436_s22 = scalar_lea.vmem %s31_s19, 1024  ;;  %p441_p1 = scmp.lt.s32.totalorder %s31_s19, %s31_s19 }
   0x5   :  { %p437_p0 = scmp.ne.s32.totalorder %s31_s19, %s436_s22  ;;  %p442_p2 = scmp.lt.s32.totalorder %s436_s22, %s436_s22 }
   0x7   :  { %p443_p3 = por %p442_p2, %p441_p1 }
   0x9   :  { %p444_p4 = pnand %p443_p3, %p437_p0 }
   0xb   :  { %447 = shalt.err (!%p444_p4)
}
   0xc   :  { %s516_s23 = smov 64   ;;  %s517_s24 = smov 4  }
   0xd   :  { %36 = dma.hbm_to_vmem [thread:$0]  %s573_s1, 1024, %s31_s19, [#allocation7], %s516_s23, %s516_s23, %s517_s24  }
   0xe   :  { %s456_s27 = scalar_lea.vmem %s19_s21, 128  ;;  %p461_p6 = scmp.lt.s32.totalorder %s19_s21, %s19_s21 }
   0xf   :  { %p457_p5 = scmp.ne.s32.totalorder %s19_s21, %s456_s27  ;;  %p462_p7 = scmp.lt.s32.totalorder %s456_s27, %s456_s27 }
  0x11   :  { %p463_p8 = por %p462_p7, %p461_p6 }
  0x13   :  { %p464_p9 = pnand %p463_p8, %p457_p5 }
  0x15   :  { %467 = shalt.err (!%p464_p9)
}
  0x16   :  { %24 = dma.hbm_to_vmem [thread:$0]  %s572_s0, 128, %s19_s21, [#allocation4], %s516_s23, %s516_s23, %s517_s24  }
  0x17   :  { %s518_s30 = smov [#allocation8]  }
  0x18   :  { %s44_s6 = sshll.u32 %s518_s30, 4  ;;  %s45_s6 = int_to_ptr.vmem [resolvable:$true] %s44_s6 }
  0x19   :  { %s476_s7 = scalar_lea.vmem %s45_s6, 1024  ;;  %p481_p11 = scmp.lt.s32.totalorder %s45_s6, %s45_s6 }
  0x1a   :  { %p477_p10 = scmp.ne.s32.totalorder %s45_s6, %s476_s7  ;;  %p482_p12 = scmp.lt.s32.totalorder %s476_s7, %s476_s7 }
  0x1c   :  { %p483_p13 = por %p482_p12, %p481_p11 }
  0x1e   :  { %p484_p0 = pnand %p483_p13, %p477_p10 }
  0x20   :  { %487 = shalt.err (!%p484_p0)
}
  0x21   :  { %50 = dma.hbm_to_vmem [thread:$0]  %s575_s3, 1024, %s45_s6, [#allocation7], %s516_s23, %s516_s23, %s517_s24  }
  0x22   :  { %508 = dma.done.wait [#allocation4], 128  }
  0x23   :  { %509 = vsyncadd [#allocation4], 4294967168 }
  0x24   :  { %510 = dma.done.wait [#allocation7], 2048  }
  0x25   :  { %511 = vsyncadd [#allocation7], 4294965248  ;;  %v519_v0 = vmov 0.0   ;;  %vm520_vm0 = vmmov 0   ;;  %v411_v1 = vld [vmem:[#allocation6 + $0x38] sm:$0xff]   ;;  %v412_v2 = vld [vmem:[#allocation6 + $0x30] sm:$0xff]  }
  0x26   :  { %361 = vmatprep.subr.bf16.mxu0 %v519_v0  ;;  %377 = vmatprep.mubr.msk.bf16.mxu0 %vm520_vm0, %v519_v0  ;;  %v413_v3 = vld [vmem:[#allocation6 + $0x28] sm:$0xff]   ;;  %v420_v4 = vld [vmem:[#allocation8 + $0x38] sm:$0xff]   ;;  %v414_v5 = vld [vmem:[#allocation6 + $0x20] sm:$0xff]   ;;  %s521_s11 = smov [#allocation9]  }
  0x27   :  { %381 = vmatprep.subr.bf16.mxu1 %v519_v0  ;;  %397 = vmatprep.mubr.msk.bf16.mxu1 %vm520_vm0, %v519_v0  ;;  %v421_v6 = vld [vmem:[#allocation8 + $0x30] sm:$0xff]   ;;  %v415_v7 = vld [vmem:[#allocation6 + $0x18] sm:$0xff]   ;;  %v422_v8 = vld [vmem:[#allocation8 + $0x28] sm:$0xff]   ;;  %s311_s12 = sshll.u32 %s521_s11, 4  ;;  %s312_s12 = int_to_ptr.vmem [resolvable:$true] %s311_s12 }
  0x28   :  { %362 = vmatpush3.bf16.msra.mxu0 %v411_v1  ;;  %382 = vmatpush3.bf16.msra.mxu1 %v420_v4  ;;  %v416_v9 = vld [vmem:[#allocation6 + $0x10] sm:$0xff]   ;;  %v423_v10 = vld [vmem:[#allocation8 + $0x20] sm:$0xff]   ;;  %v417_v11 = vld [vmem:[#allocation6 + $0x8] sm:$0xff]   ;;  %p493_p2 = scmp.lt.s32.totalorder %s312_s12, %s312_s12 }
  0x29   :  { %363 = vmatprep.subr.bf16.mxu0 %v519_v0  ;;  %383 = vmatprep.subr.bf16.mxu1 %v519_v0  ;;  %v424_v12 = vld [vmem:[#allocation8 + $0x18] sm:$0xff]   ;;  %v418_v13 = vld [vmem:[#allocation6] sm:$0xff]   ;;  %v425_v14 = vld [vmem:[#allocation8 + $0x10] sm:$0xff]  }
  0x2a   :  { %v419_v15 = vld [vmem:[#allocation3] sm:$0xff]   ;;  %v426_v16 = vld [vmem:[#allocation8 + $0x8] sm:$0xff]   ;;  %v427_v17 = vld [vmem:[#allocation8] sm:$0xff]  }
  0x2b   :  { %v324_v19 = vld [vmem:[%s574_s2] ss:$0 sm:$0xff]  ;;  %s488_s2 = scalar_lea.vmem %s312_s12, 256 }
  0x2c   :  { %364 = vmatpush3.bf16.msra.mxu0 %v412_v2  ;;  %384 = vmatpush3.bf16.msra.mxu1 %v421_v6  ;;  %v334_v26 = vld [vmem:[%s576_s4] ss:$0 sm:$0xff]  ;;  %p489_p1 = scmp.ne.s32.totalorder %s312_s12, %s488_s2  ;;  %p494_p3 = scmp.lt.s32.totalorder %s488_s2, %s488_s2 }
  0x2d   :  { %365 = vmatprep.subr.bf16.mxu0 %v519_v0  ;;  %385 = vmatprep.subr.bf16.mxu1 %v519_v0 }
  0x2e   :  { %p495_p4 = por %p494_p3, %p493_p2 }
  0x30   :  { %366 = vmatpush3.bf16.msra.mxu0 %v413_v3  ;;  %386 = vmatpush3.bf16.msra.mxu1 %v422_v8  ;;  %p496_p5 = pnand %p495_p4, %p489_p1 }
  0x31   :  { %367 = vmatprep.subr.bf16.mxu0 %v519_v0  ;;  %387 = vmatprep.subr.bf16.mxu1 %v519_v0 }
  0x34   :  { %368 = vmatpush3.bf16.msra.mxu0 %v414_v5  ;;  %388 = vmatpush3.bf16.msra.mxu1 %v423_v10 }
  0x35   :  { %369 = vmatprep.subr.bf16.mxu0 %v519_v0  ;;  %389 = vmatprep.subr.bf16.mxu1 %v519_v0 }
  0x38   :  { %370 = vmatpush3.bf16.msra.mxu0 %v415_v7  ;;  %390 = vmatpush3.bf16.msra.mxu1 %v424_v12 }
  0x39   :  { %371 = vmatprep.subr.bf16.mxu0 %v519_v0  ;;  %391 = vmatprep.subr.bf16.mxu1 %v519_v0 }
  0x3c   :  { %372 = vmatpush3.bf16.msra.mxu0 %v416_v9  ;;  %392 = vmatpush3.bf16.msra.mxu1 %v425_v14 }
  0x3d   :  { %373 = vmatprep.subr.bf16.mxu0 %v519_v0  ;;  %393 = vmatprep.subr.bf16.mxu1 %v519_v0 }
  0x40   :  { %374 = vmatpush3.bf16.msra.mxu0 %v417_v11  ;;  %394 = vmatpush3.bf16.msra.mxu1 %v426_v16 }
  0x41   :  { %375 = vmatprep.subr.bf16.mxu0 %v519_v0  ;;  %395 = vmatprep.subr.bf16.mxu1 %v519_v0 }
  0x44   :  { %376 = vmatpush3.bf16.msra.mxu0 %v418_v13  ;;  %396 = vmatpush3.bf16.msra.mxu1 %v427_v17 }
  0x47   :  { %378 = vmatmul.mubr.bf16.vlgmr.msra.gmra.mxu0 %v419_v15 }
 0x107   :  { %v180_v18 = vpop.f32.mrf.mxu0 }
 0x108   :  { %v181_v22 = vadd.f32 %v324_v19, %v180_v18 }
 0x109   :  { %v379_v20 = vpop.f32.mrf.mxu0 }
 0x10b   :  { %v183_v21 = vpop.f32.mrf.mxu0 }
 0x10c   :  { %v184_v23 = vadd.f32 %v324_v19, %v183_v21 }
 0x10d   :  { %v380_v24 = vpop.f32.mrf.mxu0 }
 0x10e   :  { %v191_v25 = vpack.c.bf16 %v184_v23, %v181_v22 }
 0x110   :  { %398 = vmatmul.mubr.bf16.vlgmr.msra.gmra.mxu1 %v191_v25 }
 0x1d0   :  { %v297_v27 = vpop.f32.mrf.mxu1 }
 0x1d1   :  { %v298_v28 = vadd.f32 %v334_v26, %v297_v27 }
 0x1d2   :  { %v399_v29 = vpop.f32.mrf.mxu1 }
 0x1d3   :  { %304 = vst [vmem:[#allocation9] sm:$0xff] %v298_v28 }
 0x1d4   :  { %v300_v30 = vpop.f32.mrf.mxu1 }
 0x1d5   :  { %v301_v31 = vadd.f32 %v334_v26, %v300_v30 }
 0x1d6   :  { %v400_v32 = vpop.f32.mrf.mxu1 }
 0x1d7   :  { %305 = vst [vmem:[#allocation9 + $0x8] sm:$0xff] %v301_v31 }
 0x1d8   :  { %499 = shalt.err (!%p496_p5)
}
 0x1d9   :  { %s522_s13 = smov 128   ;;  %s523_s4 = smov 8  }
 0x1da   :  { %317 = dma.vmem_to_hbm [thread:$0]  %s312_s12, 256, %s577_s5, [#allocation5], %s522_s13, %s522_s13, %s523_s4  }
 0x1db   :  { %512 = dma.done.wait [#allocation5], 256  }
 0x1dc   :  { %513 = vsyncadd [#allocation5], 4294967040 }
 0x1dd   :  { %321 = vsyncpa [#allocation4], 1 }
 0x1de   :  { %322 = vsyncpa [#allocation7], 1 }
 0x1df   :  { %323 = vsyncpa [#allocation5], 1 }

</bundles_post_ra>
